<compile_context>
chip_gen: v6e
topology: v6e:2x2x1
jax: 0.10.0
libtpu: 0.0.40
codegen_flags: <defaults>
</compile_context>

<pallas_src>
import functools

import jax
import jax.numpy as jnp
from jax.experimental import pallas as pl
from jax.experimental.pallas import tpu as pltpu


def _triplet_loss_kernel(a_ref, p_ref, n_ref, o_ref, *, margin, eps,
                         true_b, tile_b):
    a = a_ref[...].astype(jnp.float32)
    p = p_ref[...].astype(jnp.float32)
    n = n_ref[...].astype(jnp.float32)

    # Hoist ||a||^2: shared by both cosine terms (saves one (TB,D) multiply
    # and one cross-lane reduction per tile).
    aa = jnp.sum(a * a, axis=1, keepdims=True)                # (TB, 1)

    ap = jnp.sum(a * p, axis=1, keepdims=True)                # (TB, 1)
    pp = jnp.sum(p * p, axis=1, keepdims=True)
    an = jnp.sum(a * n, axis=1, keepdims=True)
    nn = jnp.sum(n * n, axis=1, keepdims=True)

    def cosine(dot, xx, yy):
        # PyTorch clamp semantics: dot / max(||x|| * ||y||, eps).
        # Single sqrt of the product (instead of sqrt(xx)*sqrt(yy)); exact
        # divide keeps bit-comparability with the reference near zero norms.
        denom = jnp.maximum(jnp.sqrt(xx * yy), eps)
        return dot / denom

    d_pos = cosine(ap, aa, pp)                                # (TB, 1)
    d_neg = cosine(an, aa, nn)                                # (TB, 1)
    losses = jnp.maximum(d_neg - d_pos + margin, 0.0)         # relu, (TB, 1)

    # Mask zero-padded rows of the (possibly ragged) last tile.
    row = (pl.program_id(0) * tile_b
           + jax.lax.broadcasted_iota(jnp.int32, losses.shape, 0))
    losses = jnp.where(row < true_b, losses, 0.0)

    # Per-tile partial sum; the mean (divide by true B) happens outside.
    o_ref[0, 0] = jnp.sum(losses)


def _choose_tile_b(B, D):
    # Budget: 3 inputs x 2 pipeline buffers x (TB x D x 4 B) <= ~8 MiB, which
    # stays under every generation's scoped-VMEM default (v5e 16 MiB,
    # v6e/v7x 32 MiB) while leaving headroom.
    budget_bytes = 8 * 1024 * 1024
    tb = budget_bytes // (3 * 2 * D * 4)
    tb = max(8, min(int(tb), 1024))
    if tb >= B:
        return B                       # one tile covers the whole batch
    return (tb // 8) * 8               # keep sublane (8) alignment


def triplet_loss(A, P, N, margin=1.0, eps=1e-6, tile_b=None):
    B, D = A.shape
    TB = tile_b if tile_b is not None else _choose_tile_b(B, D)
    TB = min(TB, B) if TB >= B else TB

    num_tiles = pl.cdiv(B, TB)
    B_pad = num_tiles * TB
    if B_pad != B:
        pad = ((0, B_pad - B), (0, 0))
        A = jnp.pad(A, pad)
        P = jnp.pad(P, pad)
        N = jnp.pad(N, pad)

    kernel = functools.partial(_triplet_loss_kernel, margin=margin, eps=eps,
                               true_b=B, tile_b=TB)

    in_spec = pl.BlockSpec((TB, D), lambda i: (i, 0))
    partials = pl.pallas_call(
        kernel,
        out_shape=jax.ShapeDtypeStruct((num_tiles, 1), jnp.float32),
        grid_spec=pltpu.PrefetchScalarGridSpec(
            num_scalar_prefetch=0,
            grid=(num_tiles,),
            in_specs=[in_spec, in_spec, in_spec],
            out_specs=pl.BlockSpec(
                (1, 1), lambda i: (i, 0), memory_space=pltpu.SMEM
            ),
        ),
        compiler_params=pltpu.CompilerParams(
            dimension_semantics=("parallel",),
            vmem_limit_bytes=32 * 1024 * 1024,
        ),
        cost_estimate=pl.CostEstimate(
            flops=10 * B_pad * D,            # 5 dot-products of length D / row
            transcendentals=2 * B_pad,       # two sqrts per row
            bytes_accessed=3 * B_pad * D * 4 + num_tiles * 4,
        ),
    )(A, P, N)

    return jnp.sum(partials) / B


def _reference(A, P, N, margin=1.0, eps=1e-6):
    def cosine(x, y):
        dot = jnp.sum(x * y, axis=1)
        nx = jnp.sqrt(jnp.sum(x * x, axis=1))
        ny = jnp.sqrt(jnp.sum(y * y, axis=1))
        return dot / jnp.maximum(nx * ny, eps)

    losses = jnp.maximum(cosine(A, N) - cosine(A, P) + margin, 0.0)
    return jnp.mean(losses)


if __name__ == "__main__":
    key = jax.random.PRNGKey(0)

    # Small shape consistent with the module: batch=8, hidden=32.
    ka, kp, kn = jax.random.split(key, 3)
    B, D = 8, 32
    A = jax.random.normal(ka, (B, D), dtype=jnp.float32)
    P = jax.random.normal(kp, (B, D), dtype=jnp.float32)
    N = jax.random.normal(kn, (B, D), dtype=jnp.float32)

    loss = jax.block_until_ready(triplet_loss(A, P, N, margin=1.0))
    ref = _reference(A, P, N, margin=1.0)
    assert jnp.allclose(loss, ref, atol=1e-5, rtol=1e-5), (loss, ref)

    # Second check exercising batch tiling, ragged-last-tile padding and
    # row masking (B=50 with a forced TB=16 -> 4 tiles, 14 padded rows).
    kb = jax.random.split(key, 6)
    B2, D2 = 50, 32
    A2 = jax.random.normal(kb[3], (B2, D2), dtype=jnp.float32)
    P2 = jax.random.normal(kb[4], (B2, D2), dtype=jnp.float32)
    N2 = jax.random.normal(kb[5], (B2, D2), dtype=jnp.float32)

    loss2 = jax.block_until_ready(triplet_loss(A2, P2, N2, margin=1.0, tile_b=16))
    ref2 = _reference(A2, P2, N2, margin=1.0)
    assert jnp.allclose(loss2, ref2, atol=1e-5, rtol=1e-5), (loss2, ref2)

    print("KERNEL_OK")
</pallas_src>

<mosaic_0001>
module attributes {stable_mosaic.version = 11 : i64} {
  func.func @_triplet_loss_kernel(%arg0: i32, %arg1: memref<8x32xf32, #tpu.memory_space<vmem>>, %arg2: memref<8x32xf32, #tpu.memory_space<vmem>>, %arg3: memref<8x32xf32, #tpu.memory_space<vmem>>, %arg4: memref<1x1xf32, #tpu.memory_space<smem>>) attributes {dimension_semantics = [#tpu.dimension_semantics<parallel>], iteration_bounds = array<i64: 1>, scalar_prefetch = 0 : i64, scratch_operands = 0 : i64, tpu.core_type = #tpu.core_type<tc>, window_params = [{transform_indices = @transform_0, window_bounds = array<i64: 8, 32>}, {transform_indices = @transform_1, window_bounds = array<i64: 8, 32>}, {transform_indices = @transform_2, window_bounds = array<i64: 8, 32>}, {transform_indices = @transform_3, window_bounds = array<i64: 1, 1>}]} {
    %c0 = arith.constant 0 : index
    %c0_0 = arith.constant 0 : index
    %0 = vector.load %arg1[%c0, %c0_0] : memref<8x32xf32, #tpu.memory_space<vmem>>, vector<8x32xf32>
    %c0_1 = arith.constant 0 : index
    %c0_2 = arith.constant 0 : index
    %1 = vector.load %arg2[%c0_1, %c0_2] : memref<8x32xf32, #tpu.memory_space<vmem>>, vector<8x32xf32>
    %c0_3 = arith.constant 0 : index
    %c0_4 = arith.constant 0 : index
    %2 = vector.load %arg3[%c0_3, %c0_4] : memref<8x32xf32, #tpu.memory_space<vmem>>, vector<8x32xf32>
    %3 = arith.mulf %0, %0 : vector<8x32xf32>
    %cst = arith.constant dense<0.000000e+00> : vector<8xf32>
    %4 = vector.multi_reduction <add>, %3, %cst [1] : vector<8x32xf32> to vector<8xf32>
    %5 = vector.shape_cast %4 : vector<8xf32> to vector<8x1xf32>
    %6 = arith.mulf %0, %1 : vector<8x32xf32>
    %cst_5 = arith.constant dense<0.000000e+00> : vector<8xf32>
    %7 = vector.multi_reduction <add>, %6, %cst_5 [1] : vector<8x32xf32> to vector<8xf32>
    %8 = vector.shape_cast %7 : vector<8xf32> to vector<8x1xf32>
    %9 = arith.mulf %1, %1 : vector<8x32xf32>
    %cst_6 = arith.constant dense<0.000000e+00> : vector<8xf32>
    %10 = vector.multi_reduction <add>, %9, %cst_6 [1] : vector<8x32xf32> to vector<8xf32>
    %11 = vector.shape_cast %10 : vector<8xf32> to vector<8x1xf32>
    %12 = arith.mulf %0, %2 : vector<8x32xf32>
    %cst_7 = arith.constant dense<0.000000e+00> : vector<8xf32>
    %13 = vector.multi_reduction <add>, %12, %cst_7 [1] : vector<8x32xf32> to vector<8xf32>
    %14 = vector.shape_cast %13 : vector<8xf32> to vector<8x1xf32>
    %15 = arith.mulf %2, %2 : vector<8x32xf32>
    %cst_8 = arith.constant dense<0.000000e+00> : vector<8xf32>
    %16 = vector.multi_reduction <add>, %15, %cst_8 [1] : vector<8x32xf32> to vector<8xf32>
    %17 = vector.shape_cast %16 : vector<8xf32> to vector<8x1xf32>
    %18 = arith.mulf %5, %11 : vector<8x1xf32>
    %19 = math.sqrt %18 : vector<8x1xf32>
    %cst_9 = arith.constant 9.99999997E-7 : f32
    %20 = vector.broadcast %cst_9 : f32 to vector<8x1xf32>
    %21 = arith.maximumf %19, %20 : vector<8x1xf32>
    %22 = arith.divf %8, %21 : vector<8x1xf32>
    %23 = arith.mulf %5, %17 : vector<8x1xf32>
    %24 = math.sqrt %23 : vector<8x1xf32>
    %cst_10 = arith.constant 9.99999997E-7 : f32
    %25 = vector.broadcast %cst_10 : f32 to vector<8x1xf32>
    %26 = arith.maximumf %24, %25 : vector<8x1xf32>
    %27 = arith.divf %14, %26 : vector<8x1xf32>
    %28 = arith.subf %27, %22 : vector<8x1xf32>
    %cst_11 = arith.constant 1.000000e+00 : f32
    %29 = vector.broadcast %cst_11 : f32 to vector<8x1xf32>
    %30 = arith.addf %28, %29 : vector<8x1xf32>
    %cst_12 = arith.constant 0.000000e+00 : f32
    %31 = vector.broadcast %cst_12 : f32 to vector<8x1xf32>
    %32 = arith.maximumf %30, %31 : vector<8x1xf32>
    %c8_i32 = arith.constant 8 : i32
    %33 = arith.muli %arg0, %c8_i32 : i32
    %34 = tpu.iota {dimensions = array<i32: 0>} : vector<8x1xi32>
    %35 = vector.broadcast %33 : i32 to vector<8x1xi32>
    %36 = arith.addi %35, %34 : vector<8x1xi32>
    %c8_i32_13 = arith.constant 8 : i32
    %37 = vector.broadcast %c8_i32_13 : i32 to vector<8x1xi32>
    %38 = arith.cmpi slt, %36, %37 : vector<8x1xi32>
    %cst_14 = arith.constant 0.000000e+00 : f32
    %39 = vector.broadcast %cst_14 : f32 to vector<8x1xf32>
    %40 = arith.select %38, %32, %39 : vector<8x1xi1>, vector<8x1xf32>
    %41 = vector.shape_cast %40 : vector<8x1xf32> to vector<1x8x1xf32>
    %cst_15 = arith.constant dense<0.000000e+00> : vector<1xf32>
    %42 = vector.multi_reduction <add>, %41, %cst_15 [1, 2] : vector<1x8x1xf32> to vector<1xf32>
    %43 = vector.shape_cast %42 : vector<1xf32> to vector<1x1x1xf32>
    %44 = vector.extract %43[0, 0, 0] : f32 from vector<1x1x1xf32>
    %c0_16 = arith.constant 0 : index
    %c0_17 = arith.constant 0 : index
    %45 = memref.load %arg4[%c0_16, %c0_17] : memref<1x1xf32, #tpu.memory_space<smem>>
    memref.store %44, %arg4[%c0_16, %c0_17] : memref<1x1xf32, #tpu.memory_space<smem>>
    return
  }
  func.func @transform_0(%arg0: i32) -> (i32, i32) {
    %c0_i32 = arith.constant 0 : i32
    %c0_i32_0 = arith.constant 0 : i32
    return %arg0, %c0_i32 : i32, i32
  }
  func.func @transform_1(%arg0: i32) -> (i32, i32) {
    %c0_i32 = arith.constant 0 : i32
    %c0_i32_0 = arith.constant 0 : i32
    return %arg0, %c0_i32 : i32, i32
  }
  func.func @transform_2(%arg0: i32) -> (i32, i32) {
    %c0_i32 = arith.constant 0 : i32
    %c0_i32_0 = arith.constant 0 : i32
    return %arg0, %c0_i32 : i32, i32
  }
  func.func @transform_3(%arg0: i32) -> (i32, i32) {
    %c0_i32 = arith.constant 0 : i32
    %c0_i32_0 = arith.constant 0 : i32
    return %arg0, %c0_i32 : i32, i32
  }
}

</mosaic_0001>

<bundles_post_ra>
// kernel: tpu_custom_call.1
= control target key start
LH: loop header
LB: loop body
LE: loop exit
PB: predicated region body
PF: predicated region fallthrough
CT: control target
= control target key end

     0   :  { %8 = vsyncpa [#allocation3], 0  ;;  %s263_s0 = inlined_call_operand.hbm [shape: f32[8,32], index: 0, kind: input, shape index: {}]   ;;  %s264_s1 = inlined_call_operand.hbm [shape: f32[8,32], index: 1, kind: input, shape index: {}]   ;;  %s265_s2 = inlined_call_operand.hbm [shape: f32[8,32], index: 2, kind: input, shape index: {}]   ;;  %s266_s3 = inlined_call_operand.hbm [shape: f32[1,1], index: 3, kind: output, shape index: {}]  }
   0x1   :  { %9 = vsyncpa [#allocation6], 0 }
   0x2   :  { %10 = vsyncpa [#allocation4], 0  ;;  %s222_s12 = smov [#allocation5]   ;;  %s223_s14 = smov [#allocation2]  }
   0x3   :  { %s27_s13 = sshll.u32 %s222_s12, 4  ;;  %s17_s15 = sshll.u32 %s223_s14, 4  ;;  %s28_s13 = int_to_ptr.vmem [resolvable:$true] %s27_s13  ;;  %s18_s15 = int_to_ptr.vmem [resolvable:$true] %s17_s15 }
   0x4   :  { %s156_s16 = scalar_lea.vmem %s28_s13, 128  ;;  %p161_p1 = scmp.lt.s32.totalorder %s28_s13, %s28_s13 }
   0x5   :  { %p157_p0 = scmp.ne.s32.totalorder %s28_s13, %s156_s16  ;;  %p162_p2 = scmp.lt.s32.totalorder %s156_s16, %s156_s16 }
   0x7   :  { %p163_p3 = por %p162_p2, %p161_p1 }
   0x9   :  { %p164_p4 = pnand %p163_p3, %p157_p0 }
   0xb   :  { %167 = shalt.err (!%p164_p4)
}
   0xc   :  { %30 = dma.hbm_to_vmem [thread:$0]  %s264_s1, 128, %s28_s13, [#allocation6]  }
   0xd   :  { %s176_s19 = scalar_lea.vmem %s18_s15, 128  ;;  %p181_p6 = scmp.lt.s32.totalorder %s18_s15, %s18_s15 }
   0xe   :  { %p177_p5 = scmp.ne.s32.totalorder %s18_s15, %s176_s19  ;;  %p182_p7 = scmp.lt.s32.totalorder %s176_s19, %s176_s19 }
  0x10   :  { %p183_p8 = por %p182_p7, %p181_p6 }
  0x12   :  { %p184_p9 = pnand %p183_p8, %p177_p5 }
  0x14   :  { %187 = shalt.err (!%p184_p9)
}
  0x15   :  { %20 = dma.hbm_to_vmem [thread:$0]  %s263_s0, 128, %s18_s15, [#allocation3]  }
  0x16   :  { %s224_s22 = smov [#allocation7]  }
  0x17   :  { %s37_s23 = sshll.u32 %s224_s22, 4  ;;  %s38_s23 = int_to_ptr.vmem [resolvable:$true] %s37_s23 }
  0x18   :  { %s196_s24 = scalar_lea.vmem %s38_s23, 128  ;;  %p201_p11 = scmp.lt.s32.totalorder %s38_s23, %s38_s23 }
  0x19   :  { %p197_p10 = scmp.ne.s32.totalorder %s38_s23, %s196_s24  ;;  %p202_p12 = scmp.lt.s32.totalorder %s196_s24, %s196_s24 }
  0x1b   :  { %p203_p13 = por %p202_p12, %p201_p11 }
  0x1d   :  { %p204_p0 = pnand %p203_p13, %p197_p10 }
  0x1f   :  { %207 = shalt.err (!%p204_p0)
}
  0x20   :  { %40 = dma.hbm_to_vmem [thread:$0]  %s265_s2, 128, %s38_s23, [#allocation6]  }
  0x21   :  { %216 = dma.done.wait [#allocation3], 128  }
  0x22   :  { %217 = vsyncadd [#allocation3], 4294967168 }
  0x23   :  { %218 = dma.done.wait [#allocation6], 256  }
  0x24   :  { %219 = vsyncadd [#allocation6], 4294967040  ;;  %v52_v0 = vld [vmem:[#allocation7] sm:$0xff]  ;;  %vm54_vm0 = vcmask 261120   ;;  %v50_v1 = vld [vmem:[#allocation2] sm:$0xff]  ;;  %vm106_vm5 = vcmask 7168  }
  0x25   :  { %v51_v2 = vld [vmem:[#allocation5] sm:$0xff]  ;;  %v70_v3 = vmul.f32 %v52_v0, %v52_v0  ;;  %v53_v4 = vmul.f32 %v50_v1, %v50_v1  ;;  %v66_v10 = vmul.f32 %v52_v0, %v50_v1  ;;  %s225_s2 = smov [#allocation8]  }
  0x26   :  { %v62_v5 = vmul.f32 %v51_v2, %v51_v2  ;;  %v58_v6 = vmul.f32 %v51_v2, %v50_v1 }
  0x27   :  { %v71_v7 = vsel %vm54_vm0, %v70_v3, 0.0  ;;  %v55_v8 = vsel %vm54_vm0, %v53_v4, 0.0  ;;  %v67_v12 = vsel %vm54_vm0, %v66_v10, 0.0 }
  0x28   :  { %72 = vadd.xlane.f32.xlu1 %v71_v7  ;;  %56 = vadd.xlane.f32.xlu0 %v55_v8  ;;  %v63_v9 = vsel %vm54_vm0, %v62_v5, 0.0  ;;  %v59_v11 = vsel %vm54_vm0, %v58_v6, 0.0 }
  0x2c   :  { %64 = vadd.xlane.f32.xlu0 %v63_v9  ;;  %60 = vadd.xlane.f32.xlu1 %v59_v11 }
  0x30   :  { %68 = vadd.xlane.f32.xlu0 %v67_v12 }
  0xb1   :  { %v73_v13 = vpop.xlane.xlu1 %72  ;;  %v57_v14 = vpop.xlane.xlu0 %56 }
  0xb2   :  { %v85_v15 = vmul.f32 %v73_v13, %v57_v14 }
  0xb4   :  { %140 = vrsqrt.f32 %v85_v15  ;;  %vm88_vm1 = vcmp.eq.f32.partialorder %v85_v15, inf  ;;  %v91_v20 = vand.u32 2147483648, %v85_v15  ;;  %vm90_vm2 = vcmp.eq.f32.partialorder %v85_v15, 0.0 }
  0xb5   :  { %v65_v16 = vpop.xlane.xlu0 %64  ;;  %v61_v32 = vpop.xlane.xlu1 %60 }
  0xb6   :  { %v74_v17 = vmul.f32 %v65_v16, %v57_v14 }
  0xb8   :  { %142 = vrsqrt.f32 %v74_v17  ;;  %vm77_vm3 = vcmp.eq.f32.partialorder %v74_v17, inf  ;;  %v80_v26 = vand.u32 2147483648, %v74_v17  ;;  %vm79_vm4 = vcmp.eq.f32.partialorder %v74_v17, 0.0 }
  0xb9   :  { %v69_v31 = vpop.xlane.xlu0 %68 }
  0xc1   :  { %v141_v18 = vpop.eup %140 }
  0xc2   :  { %v87_v19 = vmul.f32 %v141_v18, %v85_v15 }
  0xc4   :  { %v89_v21 = vsel %vm88_vm1, %v85_v15, %v87_v19 }
  0xc5   :  { %v143_v22 = vpop.eup %142  ;;  %v92_v23 = vsel %vm90_vm2, %v91_v20, %v89_v21 }
  0xc6   :  { %v76_v24 = vmul.f32 %v143_v22, %v74_v17  ;;  %v93_v25 = vmax.f32 %v92_v23, 1e-06 }
  0xc8   :  { %v78_v27 = vsel %vm77_vm3, %v74_v17, %v76_v24  ;;  %144 = vrcp.f32 %v93_v25 }
  0xc9   :  { %v81_v28 = vsel %vm79_vm4, %v80_v26, %v78_v27 }
  0xca   :  { %v82_v29 = vmax.f32 %v81_v28, 1e-06 }
  0xcc   :  { %146 = vrcp.f32 %v82_v29 }
  0xd5   :  { %v145_v30 = vpop.eup %144 }
  0xd6   :  { %v95_v34 = vmul.f32 %v145_v30, %v69_v31 }
  0xd9   :  { %v147_v33 = vpop.eup %146 }
  0xda   :  { %v84_v35 = vmul.f32 %v147_v33, %v61_v32 }
  0xdc   :  { %v96_v36 = vsub.f32 %v95_v34, %v84_v35 }
  0xde   :  { %v97_v37 = vadd.f32 1.0, %v96_v36 }
  0xe0   :  { %v98_v38 = vmax.f32 %v97_v37, 0.0 }
  0xe2   :  { %v107_v39 = vsel %vm106_vm5, %v98_v38, 0.0 }
  0xe3   :  { %108 = vadd.xlane.f32.xlu1 %v107_v39 }
 0x16c   :  { %v109_v40 = vpop.xlane.xlu1 %108 }
 0x16d   :  { %v110_v41 = vrot.slane %v109_v40, 4 }
 0x16f   :  { %v111_v42 = vadd.f32 %v110_v41, %v109_v40 }
 0x171   :  { %v112_v43 = vrot.slane %v111_v42, 2 }
 0x173   :  { %v113_v44 = vadd.f32 %v112_v43, %v111_v42 }
 0x175   :  { %v114_v45 = vrot.slane %v113_v44, 1 }
 0x177   :  { %v115_v46 = vadd.f32 %v114_v45, %v113_v44 }
 0x179   :  { %134 = vpush %v115_v46 }
 0x1aa   :  { %s135_s0 = spop %134 }
 0x1ab   :  { %118 = sst [smem:[#allocation8]] %s135_s0 }
 0x1ac   :  { %126 = dma.smem_to_hbm %s225_s2, 16, %s266_s3, [#allocation4]  }
 0x1ad   :  { %220 = dma.done.wait [#allocation4], 16  }
 0x1ae   :  { %221 = vsyncadd [#allocation4], 4294967280 }
 0x1af   :  { %130 = sfence }
 0x1b0   :  { %131 = vsyncpa [#allocation3], 1 }
 0x1b1   :  { %132 = vsyncpa [#allocation6], 1 }
 0x1b2   :  { %133 = vsyncpa [#allocation4], 1 }

</bundles_post_ra>
